<compile_context>
chip_gen: v5e
topology: v5e:2x2
jax: 0.10.0
libtpu: 0.0.40
codegen_flags: <defaults>
</compile_context>

<pallas_src>
import functools

import jax
import jax.numpy as jnp
from jax import lax
from jax.experimental import pallas as pl
from jax.experimental.pallas import tpu as pltpu

NUM_OPS = 3        # [skip, relu(conv1x1), relu(conv_k3)]
TC_NODES = 3       # args.tc_nodes
# (src, dst, weight_row) — a small fixed cell_arch (candidate-op list elided)
CELL_ARCH = [
    (0, 1, 0),
    (0, 2, 1),
    (1, 2, 2),
    (0, 3, 3),
    (2, 3, 4),
]
NUM_EDGES = len(CELL_ARCH)
MXU_DTYPE = jnp.bfloat16   # native MXU dtype on v5e/v6e/v7x


def _src_groups():
    """Group edges by source node; processing srcs in increasing order is a
    valid schedule for any DAG with src < dst (node `s` is final before its
    out-edges are emitted)."""
    groups = {}
    for src, dst, wrow in CELL_ARCH:
        groups.setdefault(src, []).append((dst, wrow))
    srcs = tuple(sorted(groups))
    return srcs, {s: tuple(groups[s]) for s in srcs}


# ----------------------------- Pallas kernel -------------------------------

def _tc_cell_kernel(*refs, T, srcs, groups):
    """Fused TC_Cell forward on a flattened (N*T, C) slab.

    refs layout:
      [0]                mw_ref : SMEM (NUM_EDGES, NUM_OPS) f32 mixture weights
      [1]                x_ref  : VMEM (N*T, C)              input (states[0])
      [2 : 2+S]          w_refs : VMEM (3C, 2C*E_src) bf16   fused per-src RHS
      [2+S : 2+2S]       b_refs : VMEM (1, 2C*E_src)  f32    fused [b1|b3] bias
      [2+2S]             o_ref  : VMEM (N*T, TC_NODES*C)     output
    """
    n_src = len(srcs)
    mw_ref = refs[0]
    x_ref = refs[1]
    w_refs = refs[2:2 + n_src]
    b_refs = refs[2 + n_src:2 + 2 * n_src]
    o_ref = refs[2 + 2 * n_src]

    NT, C = x_ref.shape

    # temporal position of every flattened row inside its own batch sample
    t_in = lax.broadcasted_iota(jnp.int32, (NT, 1), 0) % T
    has_prev = t_in != 0          # row has a valid t-1 neighbour
    has_next = t_in != (T - 1)    # row has a valid t+1 neighbour

    mxu_dtype = w_refs[0].dtype   # bf16: MXU runs native, no f32 emulation

    # node accumulators (f32, live in vregs); node 0 = input
    node = [None] * (TC_NODES + 1)
    node[0] = x_ref[...].astype(jnp.float32)

    for gi, src in enumerate(srcs):
        state = node[src]   # finalized: all in-edges of `src` already processed
        # input-side temporal shifts (XLU rolls) + zero-pad / cross-sample mask;
        # one lane-dense (NT, 3C) bf16 LHS per source state (K = 3C = 96).
        x_prev = jnp.where(has_prev, pltpu.roll(state, shift=1, axis=0), 0.0)
        x_next = jnp.where(has_next, pltpu.roll(state, shift=NT - 1, axis=0), 0.0)
        x3 = jnp.concatenate([x_prev, state, x_next], axis=-1).astype(mxu_dtype)

        # ONE fused MXU matmul for all out-edges of this source node.
        y = jnp.dot(x3, w_refs[gi][...], preferred_element_type=jnp.float32)
        # fused lane-dense bias add + relu for all edges of this group
        z = jnp.maximum(y + b_refs[gi][...], 0.0)

        for ei, (dst, wrow) in enumerate(groups[src]):
            op1 = z[:, (2 * ei) * C:(2 * ei + 1) * C]       # relu(1x1 conv)
            op2 = z[:, (2 * ei + 1) * C:(2 * ei + 2) * C]   # relu(k=3 conv)
            contrib = (mw_ref[wrow, 0] * state
                       + mw_ref[wrow, 1] * op1
                       + mw_ref[wrow, 2] * op2)
            node[dst] = contrib if node[dst] is None else node[dst] + contrib

    # torch.cat(states[-tc_nodes:], dim=1): store each node slab directly,
    # no in-kernel concat relayout.
    for j in range(TC_NODES):
        o_ref[:, j * C:(j + 1) * C] = node[1 + j].astype(o_ref.dtype)


def tc_cell_forward(x, weight, params):
    """TC_Cell.forward: x (N, T, C), weight (NUM_EDGES, NUM_OPS) -> (N, T, tc_nodes*C)."""
    N, T, C = x.shape
    srcs, groups = _src_groups()

    # Pack, per source node, one fused RHS slab (3C, 2C*E_src) and bias (1, 2C*E_src):
    #   rows    [0:C]=prev tap, [C:2C]=center, [2C:3C]=next tap
    #   columns per edge: [ op1(1x1) | op2(k=3) ]
    # (Real nn.Conv1d weights are (C_out, C_in, k): transpose to (C_in, C_out)
    #  and order taps (t-1, t, t+1) before packing.)
    w_slabs, b_slabs = [], []
    for src in srcs:
        cols_w, cols_b = [], []
        for (dst, wrow) in groups[src]:
            w1, b1, w3, b3 = params[(src, dst)]
            zeros = jnp.zeros_like(w1)
            col_op1 = jnp.concatenate([zeros, w1, zeros], axis=0)        # (3C, C)
            col_op2 = jnp.concatenate([w3[0], w3[1], w3[2]], axis=0)     # (3C, C)
            cols_w.append(jnp.concatenate([col_op1, col_op2], axis=1))   # (3C, 2C)
            cols_b.append(jnp.concatenate([b1, b3], axis=1))             # (1, 2C)
        w_slabs.append(jnp.concatenate(cols_w, axis=1).astype(MXU_DTYPE))
        b_slabs.append(jnp.concatenate(cols_b, axis=1).astype(jnp.float32))

    x2 = x.reshape(N * T, C)    # flatten batch; iota masks restore boundaries
    n_src = len(srcs)
    kernel = functools.partial(_tc_cell_kernel, T=T, srcs=srcs, groups=groups)

    out2 = pl.pallas_call(
        kernel,
        out_shape=jax.ShapeDtypeStruct((N * T, TC_NODES * C), x.dtype),
        in_specs=(
            [pl.BlockSpec(memory_space=pltpu.MemorySpace.SMEM)]            # mixture w
            + [pl.BlockSpec(memory_space=pltpu.MemorySpace.VMEM)]          # x
            + [pl.BlockSpec(memory_space=pltpu.MemorySpace.VMEM)] * n_src  # W slabs
            + [pl.BlockSpec(memory_space=pltpu.MemorySpace.VMEM)] * n_src  # biases
        ),
        out_specs=pl.BlockSpec(memory_space=pltpu.MemorySpace.VMEM),
    )(weight.astype(jnp.float32), x2, *w_slabs, *b_slabs)
    return out2.reshape(N, T, TC_NODES * C)


# ------------------------------ params -------------------------------------

def init_params(key, C):
    params = {}
    for (src, dst, _w) in CELL_ARCH:
        k = jax.random.fold_in(key, 100 * src + dst)
        k1, k2 = jax.random.split(k, 2)
        w1 = jax.random.normal(k1, (C, C), jnp.float32) / jnp.sqrt(C).astype(jnp.float32)
        b1 = jnp.zeros((1, C), jnp.float32)
        w3 = jax.random.normal(k2, (3, C, C), jnp.float32) / jnp.sqrt(3.0 * C).astype(jnp.float32)
        b3 = jnp.zeros((1, C), jnp.float32)
        params[(src, dst)] = (w1, b1, w3, b3)
    return params


# ------------------------------ reference ----------------------------------
# Pure-JAX reference; uses the same bf16 MXU-input / f32-accumulate convention
# as the kernel so the comparison isolates structural correctness.

def _mixed_edge_ref(x, mw, params, mxu_dtype):
    w1, b1, w3, b3 = params
    xb = x.astype(mxu_dtype)
    op1 = jax.nn.relu(
        jnp.einsum("ntc,cd->ntd", xb, w1.astype(mxu_dtype),
                   preferred_element_type=jnp.float32) + b1[None])
    T = x.shape[1]
    xpad = jnp.pad(xb, ((0, 0), (1, 1), (0, 0)))
    yc = sum(jnp.einsum("ntc,cd->ntd", xpad[:, k:k + T, :], w3[k].astype(mxu_dtype),
                        preferred_element_type=jnp.float32) for k in range(3))
    op2 = jax.nn.relu(yc + b3[None])
    return mw[0] * x + mw[1] * op1 + mw[2] * op2


def tc_cell_ref(x, weight, params, mxu_dtype=jnp.float32):
    states = [x]
    for dst in range(1, TC_NODES + 1):
        tmp = []
        for (src, d, w) in CELL_ARCH:
            if d != dst:
                continue
            tmp.append(_mixed_edge_ref(states[src], weight[w], params[(src, d)], mxu_dtype))
        states.append(sum(tmp))
    return jnp.concatenate(states[-TC_NODES:], axis=-1)


# --------------------------------- main -------------------------------------

if __name__ == "__main__":
    N, T, C = 2, 16, 32

    key = jax.random.PRNGKey(0)
    kx, kw, kp = jax.random.split(key, 3)

    x = jax.random.normal(kx, (N, T, C), jnp.float32)
    # architecture weights: one row per edge, softmax over candidate ops
    alphas = jax.random.normal(kw, (NUM_EDGES, NUM_OPS), jnp.float32)
    weight = jax.nn.softmax(alphas, axis=-1)
    params = init_params(kp, C)

    fwd = jax.jit(lambda x, w: tc_cell_forward(x, w, params))
    out = fwd(x, weight)
    jax.block_until_ready(out)

    expected = tc_cell_ref(x, weight, params, mxu_dtype=MXU_DTYPE)
    assert out.shape == (N, T, TC_NODES * C), out.shape
    assert jnp.allclose(out, expected, rtol=1e-2, atol=1e-2), (
        float(jnp.max(jnp.abs(out - expected))))

    print("KERNEL_OK")
</pallas_src>

<mosaic_0001>
module attributes {stable_mosaic.version = 11 : i64} {
  func.func @_tc_cell_kernel(%arg0: memref<5x3xf32, #tpu.memory_space<smem>>, %arg1: memref<32x32xf32, #tpu.memory_space<vmem>>, %arg2: memref<96x192xbf16, #tpu.memory_space<vmem>>, %arg3: memref<96x64xbf16, #tpu.memory_space<vmem>>, %arg4: memref<96x64xbf16, #tpu.memory_space<vmem>>, %arg5: memref<1x192xf32, #tpu.memory_space<vmem>>, %arg6: memref<1x64xf32, #tpu.memory_space<vmem>>, %arg7: memref<1x64xf32, #tpu.memory_space<vmem>>, %arg8: memref<32x96xf32, #tpu.memory_space<vmem>>) attributes {dimension_semantics = [], scalar_prefetch = 0 : i64, scratch_operands = 0 : i64, tpu.core_type = #tpu.core_type<tc>} {
    %0 = tpu.iota {dimensions = array<i32: 0>} : vector<32x1xi32>
    %c16_i32 = arith.constant 16 : i32
    %c0_i32 = arith.constant 0 : i32
    %1 = arith.cmpi eq, %c16_i32, %c0_i32 : i32
    %c1_i32 = arith.constant 1 : i32
    %2 = arith.select %1, %c1_i32, %c16_i32 : i32
    %3 = vector.broadcast %2 : i32 to vector<32x1xi32>
    %4 = arith.remsi %0, %3 : vector<32x1xi32>
    %c0_i32_0 = arith.constant 0 : i32
    %5 = vector.broadcast %c0_i32_0 : i32 to vector<32x1xi32>
    %6 = arith.cmpi ne, %4, %5 : vector<32x1xi32>
    %c0_i32_1 = arith.constant 0 : i32
    %7 = vector.broadcast %c0_i32_1 : i32 to vector<32x1xi32>
    %8 = arith.cmpi slt, %4, %7 : vector<32x1xi32>
    %c0_i32_2 = arith.constant 0 : i32
    %9 = arith.cmpi slt, %2, %c0_i32_2 : i32
    %10 = vector.broadcast %9 : i1 to vector<32x1xi1>
    %11 = vector.broadcast %10 : vector<32x1xi1> to vector<32x1xi1>
    %12 = arith.xori %8, %11 : vector<32x1xi1>
    %13 = arith.andi %12, %6 : vector<32x1xi1>
    %14 = vector.broadcast %2 : i32 to vector<32x1xi32>
    %15 = arith.addi %4, %14 : vector<32x1xi32>
    %16 = arith.select %13, %15, %4 : vector<32x1xi1>, vector<32x1xi32>
    %c0_i32_3 = arith.constant 0 : i32
    %17 = vector.broadcast %c0_i32_3 : i32 to vector<32x1xi32>
    %18 = arith.cmpi ne, %16, %17 : vector<32x1xi32>
    %c15_i32 = arith.constant 15 : i32
    %19 = vector.broadcast %c15_i32 : i32 to vector<32x1xi32>
    %20 = arith.cmpi ne, %16, %19 : vector<32x1xi32>
    %c0 = arith.constant 0 : index
    %c0_4 = arith.constant 0 : index
    %21 = vector.load %arg1[%c0, %c0_4] : memref<32x32xf32, #tpu.memory_space<vmem>>, vector<32x32xf32>
    %c1_i32_5 = arith.constant 1 : i32
    %22 = tpu.dynamic_rotate %21 by %c1_i32_5 dim 0 : vector<32x32xf32>, i32 -> vector<32x32xf32>
    %cst = arith.constant 0.000000e+00 : f32
    %23 = vector.shape_cast %18 : vector<32x1xi1> to vector<32x1xi1>
    %24 = vector.broadcast %23 : vector<32x1xi1> to vector<32x32xi1>
    %25 = vector.broadcast %cst : f32 to vector<32x32xf32>
    %26 = arith.select %24, %22, %25 : vector<32x32xi1>, vector<32x32xf32>
    %c31_i32 = arith.constant 31 : i32
    %27 = tpu.dynamic_rotate %21 by %c31_i32 dim 0 : vector<32x32xf32>, i32 -> vector<32x32xf32>
    %cst_6 = arith.constant 0.000000e+00 : f32
    %28 = vector.shape_cast %20 : vector<32x1xi1> to vector<32x1xi1>
    %29 = vector.broadcast %28 : vector<32x1xi1> to vector<32x32xi1>
    %30 = vector.broadcast %cst_6 : f32 to vector<32x32xf32>
    %31 = arith.select %29, %27, %30 : vector<32x32xi1>, vector<32x32xf32>
    %32 = tpu.concatenate %26, %21, %31 in 1 : vector<32x32xf32>, vector<32x32xf32>, vector<32x32xf32> -> vector<32x96xf32>
    %33 = arith.truncf %32 : vector<32x96xf32> to vector<32x96xbf16>
    %c0_7 = arith.constant 0 : index
    %c0_8 = arith.constant 0 : index
    %34 = vector.load %arg2[%c0_7, %c0_8] : memref<96x192xbf16, #tpu.memory_space<vmem>>, vector<96x192xbf16>
    %cst_9 = arith.constant dense<0.000000e+00> : vector<32x192xf32>
    %35 = tpu.matmul %33, %34, %cst_9 {dimension_numbers = #tpu.dot_dimension_numbers<[1], [0], [0], [1], [0, 0, 1, 1], [], []>} : vector<32x96xbf16>, vector<96x192xbf16>, vector<32x192xf32> -> vector<32x192xf32>
    %c0_10 = arith.constant 0 : index
    %c0_11 = arith.constant 0 : index
    %36 = vector.load %arg5[%c0_10, %c0_11] : memref<1x192xf32, #tpu.memory_space<vmem>>, vector<1x192xf32>
    %37 = vector.broadcast %36 : vector<1x192xf32> to vector<32x192xf32>
    %38 = arith.addf %35, %37 : vector<32x192xf32>
    %cst_12 = arith.constant 0.000000e+00 : f32
    %39 = vector.broadcast %cst_12 : f32 to vector<32x192xf32>
    %40 = arith.maximumf %38, %39 : vector<32x192xf32>
    %41 = vector.extract_strided_slice %40 {offsets = [0, 0], sizes = [32, 32], strides = [1, 1]} : vector<32x192xf32> to vector<32x32xf32>
    %42 = vector.extract_strided_slice %40 {offsets = [0, 32], sizes = [32, 32], strides = [1, 1]} : vector<32x192xf32> to vector<32x32xf32>
    %c0_13 = arith.constant 0 : index
    %c0_14 = arith.constant 0 : index
    %43 = memref.load %arg0[%c0_13, %c0_14] : memref<5x3xf32, #tpu.memory_space<smem>>
    %44 = vector.broadcast %43 : f32 to vector<32x32xf32>
    %45 = arith.mulf %44, %21 : vector<32x32xf32>
    %c0_15 = arith.constant 0 : index
    %c1 = arith.constant 1 : index
    %46 = memref.load %arg0[%c0_15, %c1] : memref<5x3xf32, #tpu.memory_space<smem>>
    %47 = vector.broadcast %46 : f32 to vector<32x32xf32>
    %48 = arith.mulf %47, %41 : vector<32x32xf32>
    %49 = arith.addf %45, %48 : vector<32x32xf32>
    %c0_16 = arith.constant 0 : index
    %c2 = arith.constant 2 : index
    %50 = memref.load %arg0[%c0_16, %c2] : memref<5x3xf32, #tpu.memory_space<smem>>
    %51 = vector.broadcast %50 : f32 to vector<32x32xf32>
    %52 = arith.mulf %51, %42 : vector<32x32xf32>
    %53 = arith.addf %49, %52 : vector<32x32xf32>
    %54 = vector.extract_strided_slice %40 {offsets = [0, 64], sizes = [32, 32], strides = [1, 1]} : vector<32x192xf32> to vector<32x32xf32>
    %55 = vector.extract_strided_slice %40 {offsets = [0, 96], sizes = [32, 32], strides = [1, 1]} : vector<32x192xf32> to vector<32x32xf32>
    %c1_17 = arith.constant 1 : index
    %c0_18 = arith.constant 0 : index
    %56 = memref.load %arg0[%c1_17, %c0_18] : memref<5x3xf32, #tpu.memory_space<smem>>
    %57 = vector.broadcast %56 : f32 to vector<32x32xf32>
    %58 = arith.mulf %57, %21 : vector<32x32xf32>
    %c1_19 = arith.constant 1 : index
    %c1_20 = arith.constant 1 : index
    %59 = memref.load %arg0[%c1_19, %c1_20] : memref<5x3xf32, #tpu.memory_space<smem>>
    %60 = vector.broadcast %59 : f32 to vector<32x32xf32>
    %61 = arith.mulf %60, %54 : vector<32x32xf32>
    %62 = arith.addf %58, %61 : vector<32x32xf32>
    %c1_21 = arith.constant 1 : index
    %c2_22 = arith.constant 2 : index
    %63 = memref.load %arg0[%c1_21, %c2_22] : memref<5x3xf32, #tpu.memory_space<smem>>
    %64 = vector.broadcast %63 : f32 to vector<32x32xf32>
    %65 = arith.mulf %64, %55 : vector<32x32xf32>
    %66 = arith.addf %62, %65 : vector<32x32xf32>
    %67 = vector.extract_strided_slice %40 {offsets = [0, 128], sizes = [32, 32], strides = [1, 1]} : vector<32x192xf32> to vector<32x32xf32>
    %68 = vector.extract_strided_slice %40 {offsets = [0, 160], sizes = [32, 32], strides = [1, 1]} : vector<32x192xf32> to vector<32x32xf32>
    %c3 = arith.constant 3 : index
    %c0_23 = arith.constant 0 : index
    %69 = memref.load %arg0[%c3, %c0_23] : memref<5x3xf32, #tpu.memory_space<smem>>
    %70 = vector.broadcast %69 : f32 to vector<32x32xf32>
    %71 = arith.mulf %70, %21 : vector<32x32xf32>
    %c3_24 = arith.constant 3 : index
    %c1_25 = arith.constant 1 : index
    %72 = memref.load %arg0[%c3_24, %c1_25] : memref<5x3xf32, #tpu.memory_space<smem>>
    %73 = vector.broadcast %72 : f32 to vector<32x32xf32>
    %74 = arith.mulf %73, %67 : vector<32x32xf32>
    %75 = arith.addf %71, %74 : vector<32x32xf32>
    %c3_26 = arith.constant 3 : index
    %c2_27 = arith.constant 2 : index
    %76 = memref.load %arg0[%c3_26, %c2_27] : memref<5x3xf32, #tpu.memory_space<smem>>
    %77 = vector.broadcast %76 : f32 to vector<32x32xf32>
    %78 = arith.mulf %77, %68 : vector<32x32xf32>
    %79 = arith.addf %75, %78 : vector<32x32xf32>
    %c1_i32_28 = arith.constant 1 : i32
    %80 = tpu.dynamic_rotate %53 by %c1_i32_28 dim 0 : vector<32x32xf32>, i32 -> vector<32x32xf32>
    %cst_29 = arith.constant 0.000000e+00 : f32
    %81 = vector.shape_cast %18 : vector<32x1xi1> to vector<32x1xi1>
    %82 = vector.broadcast %81 : vector<32x1xi1> to vector<32x32xi1>
    %83 = vector.broadcast %cst_29 : f32 to vector<32x32xf32>
    %84 = arith.select %82, %80, %83 : vector<32x32xi1>, vector<32x32xf32>
    %c31_i32_30 = arith.constant 31 : i32
    %85 = tpu.dynamic_rotate %53 by %c31_i32_30 dim 0 : vector<32x32xf32>, i32 -> vector<32x32xf32>
    %cst_31 = arith.constant 0.000000e+00 : f32
    %86 = vector.shape_cast %20 : vector<32x1xi1> to vector<32x1xi1>
    %87 = vector.broadcast %86 : vector<32x1xi1> to vector<32x32xi1>
    %88 = vector.broadcast %cst_31 : f32 to vector<32x32xf32>
    %89 = arith.select %87, %85, %88 : vector<32x32xi1>, vector<32x32xf32>
    %90 = tpu.concatenate %84, %53, %89 in 1 : vector<32x32xf32>, vector<32x32xf32>, vector<32x32xf32> -> vector<32x96xf32>
    %91 = arith.truncf %90 : vector<32x96xf32> to vector<32x96xbf16>
    %c0_32 = arith.constant 0 : index
    %c0_33 = arith.constant 0 : index
    %92 = vector.load %arg3[%c0_32, %c0_33] : memref<96x64xbf16, #tpu.memory_space<vmem>>, vector<96x64xbf16>
    %cst_34 = arith.constant dense<0.000000e+00> : vector<32x64xf32>
    %93 = tpu.matmul %91, %92, %cst_34 {dimension_numbers = #tpu.dot_dimension_numbers<[1], [0], [0], [1], [0, 0, 1, 1], [], []>} : vector<32x96xbf16>, vector<96x64xbf16>, vector<32x64xf32> -> vector<32x64xf32>
    %c0_35 = arith.constant 0 : index
    %c0_36 = arith.constant 0 : index
    %94 = vector.load %arg6[%c0_35, %c0_36] : memref<1x64xf32, #tpu.memory_space<vmem>>, vector<1x64xf32>
    %95 = vector.broadcast %94 : vector<1x64xf32> to vector<32x64xf32>
    %96 = arith.addf %93, %95 : vector<32x64xf32>
    %cst_37 = arith.constant 0.000000e+00 : f32
    %97 = vector.broadcast %cst_37 : f32 to vector<32x64xf32>
    %98 = arith.maximumf %96, %97 : vector<32x64xf32>
    %99 = vector.extract_strided_slice %98 {offsets = [0, 0], sizes = [32, 32], strides = [1, 1]} : vector<32x64xf32> to vector<32x32xf32>
    %100 = vector.extract_strided_slice %98 {offsets = [0, 32], sizes = [32, 32], strides = [1, 1]} : vector<32x64xf32> to vector<32x32xf32>
    %c2_38 = arith.constant 2 : index
    %c0_39 = arith.constant 0 : index
    %101 = memref.load %arg0[%c2_38, %c0_39] : memref<5x3xf32, #tpu.memory_space<smem>>
    %102 = vector.broadcast %101 : f32 to vector<32x32xf32>
    %103 = arith.mulf %102, %53 : vector<32x32xf32>
    %c2_40 = arith.constant 2 : index
    %c1_41 = arith.constant 1 : index
    %104 = memref.load %arg0[%c2_40, %c1_41] : memref<5x3xf32, #tpu.memory_space<smem>>
    %105 = vector.broadcast %104 : f32 to vector<32x32xf32>
    %106 = arith.mulf %105, %99 : vector<32x32xf32>
    %107 = arith.addf %103, %106 : vector<32x32xf32>
    %c2_42 = arith.constant 2 : index
    %c2_43 = arith.constant 2 : index
    %108 = memref.load %arg0[%c2_42, %c2_43] : memref<5x3xf32, #tpu.memory_space<smem>>
    %109 = vector.broadcast %108 : f32 to vector<32x32xf32>
    %110 = arith.mulf %109, %100 : vector<32x32xf32>
    %111 = arith.addf %107, %110 : vector<32x32xf32>
    %112 = arith.addf %66, %111 : vector<32x32xf32>
    %c1_i32_44 = arith.constant 1 : i32
    %113 = tpu.dynamic_rotate %112 by %c1_i32_44 dim 0 : vector<32x32xf32>, i32 -> vector<32x32xf32>
    %cst_45 = arith.constant 0.000000e+00 : f32
    %114 = vector.shape_cast %18 : vector<32x1xi1> to vector<32x1xi1>
    %115 = vector.broadcast %114 : vector<32x1xi1> to vector<32x32xi1>
    %116 = vector.broadcast %cst_45 : f32 to vector<32x32xf32>
    %117 = arith.select %115, %113, %116 : vector<32x32xi1>, vector<32x32xf32>
    %c31_i32_46 = arith.constant 31 : i32
    %118 = tpu.dynamic_rotate %112 by %c31_i32_46 dim 0 : vector<32x32xf32>, i32 -> vector<32x32xf32>
    %cst_47 = arith.constant 0.000000e+00 : f32
    %119 = vector.shape_cast %20 : vector<32x1xi1> to vector<32x1xi1>
    %120 = vector.broadcast %119 : vector<32x1xi1> to vector<32x32xi1>
    %121 = vector.broadcast %cst_47 : f32 to vector<32x32xf32>
    %122 = arith.select %120, %118, %121 : vector<32x32xi1>, vector<32x32xf32>
    %123 = tpu.concatenate %117, %112, %122 in 1 : vector<32x32xf32>, vector<32x32xf32>, vector<32x32xf32> -> vector<32x96xf32>
    %124 = arith.truncf %123 : vector<32x96xf32> to vector<32x96xbf16>
    %c0_48 = arith.constant 0 : index
    %c0_49 = arith.constant 0 : index
    %125 = vector.load %arg4[%c0_48, %c0_49] : memref<96x64xbf16, #tpu.memory_space<vmem>>, vector<96x64xbf16>
    %cst_50 = arith.constant dense<0.000000e+00> : vector<32x64xf32>
    %126 = tpu.matmul %124, %125, %cst_50 {dimension_numbers = #tpu.dot_dimension_numbers<[1], [0], [0], [1], [0, 0, 1, 1], [], []>} : vector<32x96xbf16>, vector<96x64xbf16>, vector<32x64xf32> -> vector<32x64xf32>
    %c0_51 = arith.constant 0 : index
    %c0_52 = arith.constant 0 : index
    %127 = vector.load %arg7[%c0_51, %c0_52] : memref<1x64xf32, #tpu.memory_space<vmem>>, vector<1x64xf32>
    %128 = vector.broadcast %127 : vector<1x64xf32> to vector<32x64xf32>
    %129 = arith.addf %126, %128 : vector<32x64xf32>
    %cst_53 = arith.constant 0.000000e+00 : f32
    %130 = vector.broadcast %cst_53 : f32 to vector<32x64xf32>
    %131 = arith.maximumf %129, %130 : vector<32x64xf32>
    %132 = vector.extract_strided_slice %131 {offsets = [0, 0], sizes = [32, 32], strides = [1, 1]} : vector<32x64xf32> to vector<32x32xf32>
    %133 = vector.extract_strided_slice %131 {offsets = [0, 32], sizes = [32, 32], strides = [1, 1]} : vector<32x64xf32> to vector<32x32xf32>
    %c4 = arith.constant 4 : index
    %c0_54 = arith.constant 0 : index
    %134 = memref.load %arg0[%c4, %c0_54] : memref<5x3xf32, #tpu.memory_space<smem>>
    %135 = vector.broadcast %134 : f32 to vector<32x32xf32>
    %136 = arith.mulf %135, %112 : vector<32x32xf32>
    %c4_55 = arith.constant 4 : index
    %c1_56 = arith.constant 1 : index
    %137 = memref.load %arg0[%c4_55, %c1_56] : memref<5x3xf32, #tpu.memory_space<smem>>
    %138 = vector.broadcast %137 : f32 to vector<32x32xf32>
    %139 = arith.mulf %138, %132 : vector<32x32xf32>
    %140 = arith.addf %136, %139 : vector<32x32xf32>
    %c4_57 = arith.constant 4 : index
    %c2_58 = arith.constant 2 : index
    %141 = memref.load %arg0[%c4_57, %c2_58] : memref<5x3xf32, #tpu.memory_space<smem>>
    %142 = vector.broadcast %141 : f32 to vector<32x32xf32>
    %143 = arith.mulf %142, %133 : vector<32x32xf32>
    %144 = arith.addf %140, %143 : vector<32x32xf32>
    %145 = arith.addf %79, %144 : vector<32x32xf32>
    %c0_59 = arith.constant 0 : index
    %c0_60 = arith.constant 0 : index
    %146 = vector.load %arg8[%c0_59, %c0_60] : memref<32x96xf32, #tpu.memory_space<vmem>>, vector<32x32xf32>
    tpu.vector_store %arg8[%c0_59, %c0_60], %53 {strides = array<i32>} : memref<32x96xf32, #tpu.memory_space<vmem>>, vector<32x32xf32>,
    %c0_61 = arith.constant 0 : index
    %c32 = arith.constant 32 : index
    %147 = vector.load %arg8[%c0_61, %c32] : memref<32x96xf32, #tpu.memory_space<vmem>>, vector<32x32xf32>
    tpu.vector_store %arg8[%c0_61, %c32], %112 {strides = array<i32>} : memref<32x96xf32, #tpu.memory_space<vmem>>, vector<32x32xf32>,
    %c0_62 = arith.constant 0 : index
    %c64 = arith.constant 64 : index
    %148 = vector.load %arg8[%c0_62, %c64] : memref<32x96xf32, #tpu.memory_space<vmem>>, vector<32x32xf32>
    tpu.vector_store %arg8[%c0_62, %c64], %145 {strides = array<i32>} : memref<32x96xf32, #tpu.memory_space<vmem>>, vector<32x32xf32>,
    return
  }
}

</mosaic_0001>

<bundles_post_ra>
// kernel: _lambda_.1
= control target key start
LH: loop header
LB: loop body
LE: loop exit
PB: predicated region body
PF: predicated region fallthrough
CT: control target
= control target key end

     0   :  { %13 = vsyncpa [#allocation5], 0  ;;  %s1744_s0 = inlined_call_operand.vmem [shape: f32[5,3], index: 0, kind: input, shape index: {}]   ;;  %s1745_s1 = inlined_call_operand.hbm [shape: f32[32,32], index: 1, kind: input, shape index: {}]   ;;  %s1746_s2 = inlined_call_operand.hbm [shape: bf16[96,192], index: 2, kind: input, shape index: {}]   ;;  %s1747_s3 = inlined_call_operand.hbm [shape: bf16[96,64], index: 3, kind: input, shape index: {}]   ;;  %s1748_s4 = inlined_call_operand.hbm [shape: bf16[96,64], index: 4, kind: input, shape index: {}]   ;;  %s1749_s5 = inlined_call_operand.vmem [shape: f32[1,192], index: 5, kind: input, shape index: {}]   ;;  %s1750_s6 = inlined_call_operand.vmem [shape: f32[1,64], index: 6, kind: input, shape index: {}, may-alias: {6,7}]   ;;  %s1751_s7 = inlined_call_operand.vmem [shape: f32[1,64], index: 7, kind: input, shape index: {}, may-alias: {6,7}]   ;;  %s1752_s8 = inlined_call_operand.hbm [shape: f32[32,96], index: 8, kind: output, shape index: {}]  }
   0x1   :  { %14 = vsyncpa [#allocation3], 0 }
   0x2   :  { %15 = vsyncpa [#allocation8], 0 }
   0x3   :  { %16 = vsyncpa [#allocation11], 0 }
   0x4   :  { %17 = vsyncpa [#allocation4], 0  ;;  %s44_s29 = sshll.u32 %s1746_s2, 4  ;;  %s1317_s30 = smov [#allocation7]   ;;  %s45_s29 = int_to_ptr.hbm [resolvable:$true] %s44_s29 }
   0x5   :  { %s46_s9 = sshll.u32 %s1317_s30, 4  ;;  %s23_s12 = sshll.u32 %s1744_s0, 4  ;;  %s47_s9 = int_to_ptr.vmem [resolvable:$true] %s46_s9  ;;  %s24_s12 = int_to_ptr.vmem [resolvable:$true] %s23_s12 }
   0x6   :  { %s1318_s13 = smov 128   ;;  %s1319_s14 = smov 8  }
   0x7   :  { %52 = dma.hbm_to_vmem [thread:$0]  %s45_s29, 1536, %s47_s9, [#allocation8], %s1318_s13, %s1318_s13, %s1319_s14  }
   0x8   :  { %s1320_s15 = smov [#allocation2]   ;;  %s31_s2 = sshll.u32 %s1745_s1, 4  ;;  %s32_s2 = int_to_ptr.hbm [resolvable:$true] %s31_s2 }
   0x9   :  { %26 = dma.vmem_to_smem %s24_s12, 128, %s1320_s15, [#allocation5]  }
   0xa   :  { %s1321_s18 = smov [#allocation6]   ;;  %s57_s0 = sshll.u32 %s1747_s3, 4  ;;  %s58_s0 = int_to_ptr.hbm [resolvable:$true] %s57_s0 }
   0xb   :  { %s33_s19 = sshll.u32 %s1321_s18, 4  ;;  %s1322_s22 = smov [#allocation9]   ;;  %s34_s19 = int_to_ptr.vmem [resolvable:$true] %s33_s19 }
   0xc   :  { %39 = dma.hbm_to_vmem [thread:$0]  %s32_s2, 512, %s34_s19, [#allocation3], %s1318_s13, %s1318_s13, %s1319_s14  }
   0xd   :  { %s59_s23 = sshll.u32 %s1322_s22, 4  ;;  %s1323_s24 = smov 64   ;;  %s60_s23 = int_to_ptr.vmem [resolvable:$true] %s59_s23 }
   0xe   :  { %s1324_s25 = smov 4   ;;  %s70_s27 = sshll.u32 %s1748_s4, 4  ;;  %s71_s27 = int_to_ptr.hbm [resolvable:$true] %s70_s27 }
   0xf   :  { %65 = dma.hbm_to_vmem [thread:$0]  %s58_s0, 768, %s60_s23, [#allocation8], %s1323_s24, %s1323_s24, %s1324_s25  }
  0x10   :  { %s1325_s28 = smov [#allocation10]  }
  0x11   :  { %s72_s3 = sshll.u32 %s1325_s28, 4  ;;  %s73_s3 = int_to_ptr.vmem [resolvable:$true] %s72_s3 }
  0x12   :  { %78 = dma.hbm_to_vmem [thread:$0]  %s71_s27, 768, %s73_s3, [#allocation11], %s1323_s24, %s1323_s24, %s1324_s25  }
  0x13   :  { %1307 = dma.done.wait [#allocation5], 128  }
  0x14   :  { %1308 = vsyncadd [#allocation5], 4294967168 }
  0x15   :  { %1309 = dma.done.wait [#allocation3], 512  }
  0x16   :  { %1310 = vsyncadd [#allocation3], 4294966784 }
  0x17   :  { %1311 = dma.done.wait [#allocation8], 2304  }
  0x18   :  { %1312 = vsyncadd [#allocation8], 4294964992 }
  0x19   :  { %1313 = dma.done.wait [#allocation11], 768  }
  0x1a   :  { %1314 = vsyncadd [#allocation11], 4294966528 }
  0x1b   :  { %105 = sfence }
  0x1c   :  { %v1399_v0 = vld [vmem:[#allocation6] sm:$0xff]  ;;  %v1401_v1 = vld [vmem:[#allocation6 + $0x8] sm:$0xff]  ;;  %v107_v2 = vlaneseq  ;;  %v1403_v3 = vld [vmem:[#allocation6 + $0x10] sm:$0xff]  ;;  %s1326_s4 = smov 32   ;;  %vm246_vm5 = vcmask 261120   ;;  %vm251_vm6 = vcmask 523264  }
  0x1d   :  { %v1123_v4 = vpack.i.bf16 %v1401_v1, %v1399_v0  ;;  %v193_v5 = vrot.slane %v1399_v0, 1  ;;  %v194_v6 = vrot.slane %v1401_v1, 1  ;;  %v195_v7 = vrot.slane %v1403_v3, 1  ;;  %v1410_v8 = vld [vmem:[#allocation6 + $0x18] sm:$0xff]  ;;  %v1011_v9 = vld [vmem:[#allocation7 + $0x50] sm:$0xf] }
  0x1e   :  { %v1412_v10 = vshrl.u32 %v107_v2, 7  ;;  %v1133_v11 = vpack.i.bf16 %v1410_v8, %v1403_v3  ;;  %v196_v12 = vrot.slane %v1410_v8, 1  ;;  %v1098_v13 = vld [vmem:[#allocation7 + $0x54] sm:$0xf0]  ;;  %v1097_v14 = vld [vmem:[#allocation7 + $0x54] sm:$0xf] }
  0x1f   :  { %1124 = vrot.lane.b32.xlu0 %v1123_v4, %s1326_s4  ;;  %v1012_v15 = vor.u32 %v1098_v13, %v1011_v9  ;;  %v1013_v16 = vld [vmem:[#allocation7 + $0x58] sm:$0xf0]  ;;  %v1003_v17 = vld [vmem:[#allocation7 + $0x40] sm:$0xf]  ;;  %v1096_v18 = vld [vmem:[#allocation7 + $0x44] sm:$0xf0] }
  0x20   :  { %v109_v19 = vadd.s32 8, %v1412_v10  ;;  %vm197_vm0 = vcmp.lt.s32.totalorder %v1412_v10, 7  ;;  %1134 = vrot.lane.b32.xlu1 %v1133_v11, %s1326_s4  ;;  %v111_v20 = vadd.s32 24, %v1412_v10  ;;  %v1095_v23 = vld [vmem:[#allocation7 + $0x44] sm:$0xf]  ;;  %v1016_v27 = vor.u32 %v1097_v14, %v1013_v16  ;;  %s1022_s9 = sld [smem:[#allocation2 + $0x2]] }
  0x21   :  { %v199_v21 = vsel %vm197_vm0, %v194_v6, %v195_v7  ;;  %v201_v22 = vsel %vm197_vm0, %v196_v12, %v193_v5  ;;  %345 = vmatpush.bf16.msra.mxu0 %v1012_v15  ;;  %v1005_v24 = vld [vmem:[#allocation7 + $0x48] sm:$0xf0]  ;;  %v1004_v28 = vor.u32 %v1096_v18, %v1003_v17  ;;  %v995_v29 = vld [vmem:[#allocation7 + $0x30] sm:$0xf]  ;;  %v1094_v30 = vld [vmem:[#allocation7 + $0x34] sm:$0xf0]  ;;  %v200_v31 = vsel %vm197_vm0, %v193_v5, %v194_v6 }
  0x22   :  { %v123_v25 = vand.u32 15, %v109_v19  ;;  %v137_v26 = vand.u32 15, %v111_v20  ;;  %v198_v32 = vsel %vm197_vm0, %v195_v7, %v196_v12  ;;  %364 = vmatpush.bf16.msra.mxu1 %v1016_v27  ;;  %v1008_v37 = vor.u32 %v1095_v23, %v1005_v24  ;;  %v1093_v41 = vld [vmem:[#allocation7 + $0x34] sm:$0xf]  ;;  %v997_v42 = vld [vmem:[#allocation7 + $0x38] sm:$0xf0] }
  0x23   :  { %v996_v38 = vor.u32 %v1094_v30, %v995_v29  ;;  %v1000_v43 = vor.u32 %v1093_v41, %v997_v42  ;;  %v987_v44 = vld [vmem:[#allocation7 + $0x20] sm:$0xf]  ;;  %v1092_v45 = vld [vmem:[#allocation7 + $0x24] sm:$0xf0]  ;;  %v1091_v46 = vld [vmem:[#allocation7 + $0x24] sm:$0xf] }
  0x24   :  { %vm1430_vm1 = vcmp.ne.s32.totalorder %v123_v25, 15  ;;  %vm1434_vm2 = vcmp.ne.s32.totalorder %v137_v26, 15  ;;  %v988_v47 = vor.u32 %v1092_v45, %v987_v44  ;;  %v989_v48 = vld [vmem:[#allocation7 + $0x28] sm:$0xf0]  ;;  %v979_v50 = vld [vmem:[#allocation7 + $0x10] sm:$0xf] }
  0x25   :  { %v211_v35 = vsel %vm1430_vm1, %v199_v21, 0.0  ;;  %v213_v36 = vsel %vm1434_vm2, %v201_v22, 0.0  ;;  %346 = vmatpush.bf16.msra.mxu0 %v1004_v28  ;;  %v992_v49 = vor.u32 %v1091_v46, %v989_v48  ;;  %v1090_v51 = vld [vmem:[#allocation7 + $0x14] sm:$0xf0]  ;;  %v1089_v53 = vld [vmem:[#allocation7 + $0x14] sm:$0xf] }
  0x26   :  { %v1128_v39 = vpack.i.bf16 %v211_v35, %v200_v31  ;;  %v1138_v40 = vpack.i.bf16 %v213_v36, %v198_v32  ;;  %365 = vmatpush.bf16.msra.mxu1 %v1008_v37  ;;  %v980_v52 = vor.u32 %v1090_v51, %v979_v50  ;;  %v981_v54 = vld [vmem:[#allocation7 + $0x18] sm:$0xf0]  ;;  %v971_v56 = vld [vmem:[#allocation7] sm:$0xf]  ;;  %v1088_v57 = vld [vmem:[#allocation7 + $0x4] sm:$0xf0]  ;;  %v406_v46 = vstv %s1022_s9 }
  0x27   :  { %v984_v55 = vor.u32 %v1089_v53, %v981_v54  ;;  %v1087_v58 = vld [vmem:[#allocation7 + $0x4] sm:$0xf]  ;;  %v972_v59 = vor.u32 %v1088_v57, %v971_v56  ;;  %v973_v60 = vld [vmem:[#allocation7 + $0x8] sm:$0xf0]  ;;  %v175_v63 = vrot.slane %v1410_v8, 7  ;;  %v116_v2 = vand.u32 15, %v1412_v10 }
  0x28   :  { %1129 = vrot.lane.b32.xlu0 %v1128_v39, %s1323_s24  ;;  %1139 = vrot.lane.b32.xlu1 %v1138_v40, %s1323_s24  ;;  %v976_v61 = vor.u32 %v1087_v58, %v973_v60  ;;  %v172_v4 = vrot.slane %v1399_v0, 7  ;;  %vm176_vm3 = vcmp.lt.s32.totalorder %v1412_v10, 1  ;;  %v173_v5 = vrot.slane %v1401_v1, 7  ;;  %v1486_v42 = vld [vmem:[%s1749_s5] sm:$0x3]  ;;  %s1327_s10 = smov 96  }
  0x29   :  { %347 = vmatpush.bf16.msra.mxu0 %v996_v38  ;;  %vm1449_vm4 = vcmp.ne.s32.totalorder %v116_v2, 0  ;;  %v110_v16 = vadd.s32 16, %v1412_v10  ;;  %vm336_vm7 = vcmask 785408   ;;  %v174_v24 = vrot.slane %v1403_v3, 7  ;;  %s1024_s5 = sld [smem:[#allocation2 + $0x81]]  ;;  %v1110_v34 = vld [vmem:[#allocation10 + $0x28] sm:$0xff] }
  0x2a   :  { %366 = vmatpush.bf16.msra.mxu1 %v1000_v43  ;;  %v180_v7 = vsel %vm176_vm3, %v175_v63, %v172_v4  ;;  %v179_v12 = vsel %vm176_vm3, %v172_v4, %v173_v5  ;;  %v272_v43 = vperm.slane %v1486_v42, 0  ;;  %s389_s11 = sld [smem:[#allocation2]]  ;;  %850 = vmatpush.bf16.msra.mxu3 %v1110_v34  ;;  %vm921_vm9 = vcmask 523520   ;;  %v1174_v26 = vld [vmem:[%s1751_s7] ss:$0 sm:$0xff]  ;;  %s1328_s26 = smov [#allocation12]  }
  0x2b   :  { %v189_v13 = vsel %vm1449_vm4, %v180_v7, 0.0  ;;  %v130_v23 = vand.u32 15, %v110_v16  ;;  %v178_v27 = vsel %vm176_vm3, %v173_v5, %v174_v24  ;;  %v177_v31 = vsel %vm176_vm3, %v174_v24, %v175_v63  ;;  %s1021_s12 = sld [smem:[#allocation2 + $0x1]]  ;;  %s951_s27 = sshll.u32 %s1328_s26, 4  ;;  %s952_s27 = int_to_ptr.vmem [resolvable:$true] %s951_s27 }
  0x2c   :  { %s1025_s15 = sld [smem:[#allocation2 + $0x82]]  ;;  %vm942_vm10 = vcmask 785920  }
  0x2d   :  { %348 = vmatpush.bf16.msra.mxu0 %v988_v47  ;;  %vm1467_vm8 = vcmp.ne.s32.totalorder %v130_v23, 0  ;;  %s1056_s16 = sld [smem:[#allocation2 + $0x101]] }
  0x2e   :  { %367 = vmatpush.bf16.msra.mxu1 %v992_v49  ;;  %v191_v32 = vsel %vm1467_vm8, %v178_v27, 0.0  ;;  %s1055_s17 = sld [smem:[#allocation2 + $0x100]] }
  0x2f   :  { %s1057_s19 = sld [smem:[#allocation2 + $0x102]] }
  0x30   :  { %v390_v63 = vstv %s389_s11  ;;  %s1028_s20 = sld [smem:[#allocation2 + $0x182]] }
  0x31   :  { %349 = vmatpush.bf16.msra.mxu0 %v980_v52  ;;  %v396_v2 = vstv %s1021_s12  ;;  %v392_v4 = vmul.f32 %v390_v63, %v1401_v1  ;;  %s1085_s21 = sld [smem:[#allocation2 + $0x201]] }
  0x32   :  { %368 = vmatpush.bf16.msra.mxu1 %v984_v55  ;;  %s1086_s0 = sld [smem:[#allocation2 + $0x202]] }
  0x33   :  { %s1084_s22 = sld [smem:[#allocation2 + $0x200]] }
  0x34   :  { %s1027_s7 = sld [smem:[#allocation2 + $0x181]] }
  0x35   :  { %350 = vmatpush.bf16.msra.mxu0 %v972_v59  ;;  %s1026_s1 = sld [smem:[#allocation2 + $0x180]] }
  0x36   :  { %369 = vmatpush.bf16.msra.mxu1 %v976_v61  ;;  %v1501_v61 = vstv %s1024_s5 }
  0x91   :  { %v1125_v62 = vpop.permute.xlu0 %1124 }
  0x92   :  { %v1127_v9 = vunpack.i.h.bf16 %v1125_v62  ;;  %v1126_v11 = vunpack.i.l.bf16 %v1125_v62  ;;  %v1135_v15 = vpop.permute.xlu1 %1134 }
  0x93   :  { %v1137_v28 = vunpack.i.h.bf16 %v1135_v15  ;;  %v1136_v29 = vunpack.i.l.bf16 %v1135_v15 }
  0x94   :  { %v247_v19 = vsel %vm246_vm5, %v189_v13, %v1126_v11  ;;  %v248_v20 = vsel %vm246_vm5, %v179_v12, %v1127_v9  ;;  %v393_v12 = vmul.f32 %v390_v63, %v1403_v3 }
  0x95   :  { %v249_v37 = vsel %vm246_vm5, %v191_v32, %v1136_v29  ;;  %v250_v38 = vsel %vm246_vm5, %v177_v31, %v1137_v28 }
  0x9a   :  { %v1130_v14 = vpop.permute.xlu0 %1129  ;;  %v1140_v30 = vpop.permute.xlu1 %1139 }
  0x9b   :  { %v1132_v17 = vunpack.i.h.bf16 %v1130_v14  ;;  %v1131_v18 = vunpack.i.l.bf16 %v1130_v14  ;;  %v1142_v35 = vunpack.i.h.bf16 %v1140_v30  ;;  %v1141_v36 = vunpack.i.l.bf16 %v1140_v30 }
  0x9d   :  { %v252_v21 = vsel %vm251_vm6, %v247_v19, %v1131_v18  ;;  %v253_v22 = vsel %vm251_vm6, %v248_v20, %v1132_v17  ;;  %v254_v39 = vsel %vm251_vm6, %v249_v37, %v1141_v36  ;;  %v255_v40 = vsel %vm251_vm6, %v250_v38, %v1142_v35 }
  0x9e   :  { %v256_v25 = vpack.c.bf16 %v253_v22, %v252_v21  ;;  %v257_v41 = vpack.c.bf16 %v255_v40, %v254_v39  ;;  %v391_v17 = vmul.f32 %v390_v63, %v1399_v0  ;;  %v394_v39 = vmul.f32 %v390_v63, %v1410_v8 }
  0xa0   :  { %1017 = vmatmul.msk.bf16.vlgmr.msra.gmra.mxu0 %vm336_vm7, %v256_v25  ;;  %1019 = vmatmul.msk.bf16.vlgmr.msra.gmra.mxu1 %vm336_vm7, %v256_v25 }
  0xb0   :  { %1018 = vmatmul.msk.bf16.gmra.mxu0 %vm336_vm7, %v257_v41  ;;  %1020 = vmatmul.msk.bf16.gmra.mxu1 %vm336_vm7, %v257_v41  ;;  %v464_v41 = vstv %s1025_s15 }
 0x11d   :  { %v352_v44 = vpop.f32.mrf.mxu0 }
 0x11e   :  { %v353_v45 = vadd.f32 %v352_v44, %v272_v43 }
 0x120   :  { %v1489_v47 = vmax.f32 %v353_v45, 0.0 }
 0x122   :  { %v407_v48 = vmul.f32 %v406_v46, %v1489_v47  ;;  %v397_v18 = vmul.f32 %v396_v2, %v1489_v47 }
 0x124   :  { %415 = vrot.lane.b32.xlu0 %v407_v48, %s1327_s10  ;;  %v401_v25 = vadd.f32 %v397_v18, %v391_v17 }
 0x125   :  { %v354_v49 = vpop.f32.mrf.mxu0 }
 0x126   :  { %v355_v50 = vadd.f32 %v354_v49, %v272_v43 }
 0x128   :  { %v383_v51 = vmax.f32 %v355_v50, 0.0 }
 0x12a   :  { %v408_v52 = vmul.f32 %v406_v46, %v383_v51  ;;  %v398_v5 = vmul.f32 %v396_v2, %v383_v51  ;;  %v440_v38 = vmul.f32 %v1501_v61, %v383_v51 }
 0x12c   :  { %417 = vrot.lane.b32.xlu2 %v408_v52, %s1327_s10  ;;  %v402_v7 = vadd.f32 %v398_v5, %v392_v4  ;;  %v1104_v5 = vld [vmem:[#allocation9 + $0x28] sm:$0xff] }
 0x12d   :  { %v357_v53 = vpop.f32.mrf.mxu0  ;;  %657 = vmatpush.bf16.msra.mxu2 %v1104_v5 }
 0x12e   :  { %v358_v54 = vadd.f32 %v357_v53, %v272_v43 }
 0x130   :  { %v1494_v55 = vmax.f32 %v358_v54, 0.0 }
 0x132   :  { %v409_v56 = vmul.f32 %v406_v46, %v1494_v55  ;;  %v399_v13 = vmul.f32 %v396_v2, %v1494_v55  ;;  %v467_v63 = vmul.f32 %v464_v41, %v1494_v55 }
 0x134   :  { %419 = vrot.lane.b32.xlu2 %v409_v56, %s1327_s10  ;;  %v403_v14 = vadd.f32 %v399_v13, %v393_v12  ;;  %v1100_v12 = vld [vmem:[#allocation9 + $0x8] sm:$0xff] }
 0x135   :  { %v359_v57 = vpop.f32.mrf.mxu0 }
 0x136   :  { %v360_v58 = vadd.f32 %v359_v57, %v272_v43  ;;  %v466_v43 = vmul.f32 %v464_v41, %v383_v51 }
 0x138   :  { %v1498_v59 = vmax.f32 %v360_v58, 0.0  ;;  %v441_v58 = vmul.f32 %v1501_v61, %v1494_v55  ;;  %v1099_v55 = vld [vmem:[#allocation9] sm:$0xff] }
 0x13a   :  { %v410_v60 = vmul.f32 %v406_v46, %v1498_v59  ;;  %v1505_v62 = vmul.f32 %v1501_v61, %v1498_v59  ;;  %v400_v40 = vmul.f32 %v396_v2, %v1498_v59  ;;  %v465_v2 = vmul.f32 %v464_v41, %v1489_v47 }
 0x13b   :  { %v468_v4 = vmul.f32 %v464_v41, %v1498_v59  ;;  %v1173_v41 = vld [vmem:[%s1750_s6] ss:$0 sm:$0xff]  ;;  %s1023_s6 = sld [smem:[#allocation2 + $0x80]] }
 0x13c   :  { %421 = vrot.lane.b32.xlu1 %v410_v60, %s1327_s10  ;;  %v404_v44 = vadd.f32 %v400_v40, %v394_v39  ;;  %v439_v60 = vmul.f32 %v1501_v61, %v1489_v47  ;;  %v1101_v61 = vld [vmem:[#allocation9 + $0x10] sm:$0xff] }
 0x186   :  { %v418_v9 = vpop.permute.xlu2 %417 }
 0x187   :  { %v1509_v11 = vadd.f32 %v418_v9, %v402_v7  ;;  %v1103_v7 = vld [vmem:[#allocation9 + $0x20] sm:$0xff]  ;;  %v1102_v9 = vld [vmem:[#allocation9 + $0x18] sm:$0xff] }
 0x188   :  { %658 = vmatpush.bf16.msra.mxu2 %v1103_v7 }
 0x189   :  { %918 = vst.msk [vmem:[#allocation12 + $0x8] sm:$0xff] %vm246_vm5, %v1509_v11  ;;  %v544_v19 = vrot.slane %v1509_v11, 1  ;;  %v532_v21 = vrot.slane %v1509_v11, 7 }
 0x18c   :  { %659 = vmatpush.bf16.msra.mxu2 %v1102_v9 }
 0x18e   :  { %v420_v15 = vpop.permute.xlu2 %419 }
 0x18f   :  { %v1515_v16 = vadd.f32 %v420_v15, %v403_v14 }
 0x190   :  { %660 = vmatpush.bf16.msra.mxu2 %v1101_v61 }
 0x191   :  { %919 = vst.msk [vmem:[#allocation12 + $0x10] sm:$0xff] %vm246_vm5, %v1515_v16  ;;  %v545_v20 = vrot.slane %v1515_v16, 1  ;;  %v533_v22 = vrot.slane %v1515_v16, 7 }
 0x193   :  { %v548_v23 = vsel %vm197_vm0, %v544_v19, %v545_v20  ;;  %v1529_v24 = vsel %vm176_vm3, %v532_v21, %v533_v22 }
 0x194   :  { %v552_v35 = vsel %vm1430_vm1, %v548_v23, 0.0  ;;  %661 = vmatpush.bf16.msra.mxu2 %v1100_v12 }
 0x196   :  { %v416_v27 = vpop.permute.xlu0 %415 }
 0x197   :  { %v1531_v28 = vadd.f32 %v416_v27, %v401_v25 }
 0x198   :  { %662 = vmatpush.bf16.msra.mxu2 %v1099_v55 }
 0x199   :  { %917 = vst.msk [vmem:[#allocation12] sm:$0xff] %vm246_vm5, %v1531_v28  ;;  %v1143_v29 = vpack.i.bf16 %v1509_v11, %v1531_v28  ;;  %v543_v30 = vrot.slane %v1531_v28, 1  ;;  %v531_v31 = vrot.slane %v1531_v28, 7 }
 0x19b   :  { %1144 = vrot.lane.b32.xlu2 %v1143_v29, %s1326_s4  ;;  %v549_v32 = vsel %vm197_vm0, %v543_v30, %v544_v19  ;;  %v537_v36 = vsel %vm176_vm3, %v531_v31, %v532_v21 }
 0x19c   :  { %v1148_v37 = vpack.i.bf16 %v552_v35, %v549_v32  ;;  %v541_v35 = vsel %vm1467_vm8, %v1529_v24, 0.0  ;;  %v685_v24 = vstv %s1056_s16 }
 0x19e   :  { %1149 = vrot.lane.b32.xlu0 %v1148_v37, %s1323_s24 }
 0x1a6   :  { %449 = vrot.lane.b32.xlu0 %v440_v38, %s1323_s24 }
 0x1ae   :  { %v422_v45 = vpop.permute.xlu1 %421  ;;  %475 = vrot.lane.b32.xlu0 %v466_v43, %s1326_s4 }
 0x1af   :  { %v1552_v46 = vadd.f32 %v422_v45, %v404_v44 }
 0x1b1   :  { %v534_v48 = vrot.slane %v1552_v46, 7  ;;  %920 = vst.msk [vmem:[#allocation12 + $0x18] sm:$0xff] %vm246_vm5, %v1552_v46  ;;  %v1153_v49 = vpack.i.bf16 %v1552_v46, %v1515_v16  ;;  %v546_v50 = vrot.slane %v1552_v46, 1 }
 0x1b3   :  { %1154 = vrot.lane.b32.xlu1 %v1153_v49, %s1326_s4  ;;  %v547_v51 = vsel %vm197_vm0, %v545_v20, %v546_v50  ;;  %v550_v52 = vsel %vm197_vm0, %v546_v50, %v543_v30  ;;  %v538_v53 = vsel %vm176_vm3, %v534_v48, %v531_v31  ;;  %v535_v54 = vsel %vm176_vm3, %v533_v22, %v534_v48 }
 0x1b4   :  { %v554_v56 = vsel %vm1434_vm2, %v550_v52, 0.0  ;;  %v539_v59 = vsel %vm1449_vm4, %v538_v53, 0.0  ;;  %v679_v48 = vstv %s1055_s17 }
 0x1b5   :  { %v1158_v57 = vpack.i.bf16 %v554_v56, %v547_v51  ;;  %v680_v50 = vmul.f32 %v679_v48, %v1531_v28  ;;  %v695_v56 = vstv %s1057_s19  ;;  %v682_v61 = vmul.f32 %v679_v48, %v1515_v16 }
 0x1b6   :  { %v432_v16 = vstv %s1023_s6 }
 0x1b7   :  { %1159 = vrot.lane.b32.xlu2 %v1158_v57, %s1323_s24 }
 0x1bb   :  { %451 = vrot.lane.b32.xlu1 %v441_v58, %s1323_s24 }
 0x1bf   :  { %447 = vrot.lane.b32.xlu2 %v439_v60, %s1323_s24  ;;  %v681_v60 = vmul.f32 %v679_v48, %v1509_v11 }
 0x1c3   :  { %477 = vrot.lane.b32.xlu1 %v467_v63, %s1326_s4 }
 0x1cb   :  { %473 = vrot.lane.b32.xlu1 %v465_v2, %s1326_s4 }
 0x1d3   :  { %479 = vrot.lane.b32.xlu1 %v468_v4, %s1326_s4 }
 0x1f5   :  { %v1145_v13 = vpop.permute.xlu2 %1144 }
 0x1f6   :  { %v1147_v47 = vunpack.i.h.bf16 %v1145_v13  ;;  %v1146_v14 = vunpack.i.l.bf16 %v1145_v13 }
 0x1f8   :  { %v587_v19 = vsel %vm246_vm5, %v539_v59, %v1146_v14  ;;  %v588_v20 = vsel %vm246_vm5, %v537_v36, %v1147_v47 }
 0x210   :  { %v1150_v15 = vpop.permute.xlu0 %1149 }
 0x211   :  { %v1152_v17 = vunpack.i.h.bf16 %v1150_v15  ;;  %v1151_v18 = vunpack.i.l.bf16 %v1150_v15  ;;  %v1160_v25 = vpop.permute.xlu2 %1159  ;;  %v683_v15 = vmul.f32 %v679_v48, %v1552_v46  ;;  %v433_v46 = vmul.f32 %v432_v16, %v1399_v0 }
 0x212   :  { %v1162_v31 = vunpack.i.h.bf16 %v1160_v25  ;;  %v1161_v32 = vunpack.i.l.bf16 %v1160_v25  ;;  %v435_v48 = vmul.f32 %v432_v16, %v1403_v3 }
 0x213   :  { %v591_v21 = vsel %vm251_vm6, %v587_v19, %v1151_v18  ;;  %v592_v22 = vsel %vm251_vm6, %v588_v20, %v1152_v17  ;;  %v434_v20 = vmul.f32 %v432_v16, %v1401_v1 }
 0x214   :  { %v595_v23 = vpack.c.bf16 %v592_v22, %v591_v21 }
 0x216   :  { %1053 = vmatmul.msk.bf16.vlgmr.msra.gmra.mxu2 %vm336_vm7, %v595_v23 }
 0x218   :  { %v450_v18 = vpop.permute.xlu0 %449 }
 0x219   :  { %v448_v19 = vpop.permute.xlu2 %447  ;;  %v460_v23 = vadd.f32 %v450_v18, %v434_v20 }
 0x220   :  { %v476_v22 = vpop.permute.xlu0 %475 }
 0x225   :  { %v1155_v27 = vpop.permute.xlu1 %1154 }
 0x226   :  { %v1157_v29 = vunpack.i.h.bf16 %v1155_v27  ;;  %v1156_v30 = vunpack.i.l.bf16 %v1155_v27  ;;  %v486_v27 = vadd.f32 %v476_v22, %v460_v23 }
 0x228   :  { %v589_v37 = vsel %vm246_vm5, %v541_v35, %v1156_v30  ;;  %v590_v36 = vsel %vm246_vm5, %v535_v54, %v1157_v29 }
 0x229   :  { %v593_v38 = vsel %vm251_vm6, %v589_v37, %v1161_v32  ;;  %v594_v39 = vsel %vm251_vm6, %v590_v36, %v1162_v31  ;;  %v459_v31 = vadd.f32 %v448_v19, %v433_v46 }
 0x22a   :  { %v596_v40 = vpack.c.bf16 %v594_v39, %v593_v38 }
 0x22c   :  { %1054 = vmatmul.msk.bf16.gmra.mxu2 %vm336_vm7, %v596_v40 }
 0x22d   :  { %v452_v17 = vpop.permute.xlu1 %451 }
 0x235   :  { %v478_v21 = vpop.permute.xlu1 %477 }
 0x299   :  { %v664_v43 = vpop.f32.mrf.mxu2 }
 0x29a   :  { %v665_v44 = vadd.f32 %v1173_v41, %v664_v43  ;;  %v371_v43 = vpop.f32.mrf.mxu1 }
 0x29c   :  { %v674_v45 = vmax.f32 %v665_v44, 0.0 }
 0x29e   :  { %v686_v49 = vmul.f32 %v685_v24, %v674_v45  ;;  %v696_v2 = vmul.f32 %v695_v56, %v674_v45 }
 0x2a0   :  { %v690_v51 = vadd.f32 %v686_v49, %v680_v50  ;;  %v273_v50 = vperm.slane %v1486_v42, 1 }
 0x2a1   :  { %v666_v52 = vpop.f32.mrf.mxu2 }
 0x2a2   :  { %v667_v53 = vadd.f32 %v1173_v41, %v666_v52  ;;  %v373_v45 = vpop.f32.mrf.mxu1 }
 0x2a4   :  { %v675_v54 = vmax.f32 %v667_v53, 0.0 }
 0x2a6   :  { %v687_v57 = vmul.f32 %v685_v24, %v675_v54  ;;  %v697_v58 = vmul.f32 %v695_v56, %v675_v54 }
 0x2a8   :  { %706 = vrot.lane.b32.xlu2 %v697_v58, %s1327_s10  ;;  %v691_v63 = vadd.f32 %v687_v57, %v681_v60  ;;  %v436_v58 = vmul.f32 %v432_v16, %v1410_v8 }
 0x2aa   :  { %v376_v49 = vpop.f32.mrf.mxu1 }
 0x2af   :  { %v669_v4 = vpop.f32.mrf.mxu2 }
 0x2b0   :  { %v670_v5 = vadd.f32 %v1173_v41, %v669_v4  ;;  %704 = vrot.lane.b32.xlu2 %v696_v2, %s1327_s10 }
 0x2b2   :  { %v676_v7 = vmax.f32 %v670_v5, 0.0  ;;  %v378_v2 = vpop.f32.mrf.mxu1 }
 0x2b4   :  { %v688_v9 = vmul.f32 %v685_v24, %v676_v7  ;;  %v698_v28 = vmul.f32 %v695_v56, %v676_v7  ;;  %v506_v7 = vstv %s1028_s20 }
 0x2b6   :  { %708 = vrot.lane.b32.xlu0 %v698_v28, %s1327_s10  ;;  %v692_v12 = vadd.f32 %v688_v9, %v682_v61 }
 0x2b7   :  { %v671_v55 = vpop.f32.mrf.mxu2 }
 0x2b8   :  { %v672_v13 = vadd.f32 %v1173_v41, %v671_v55 }
 0x2ba   :  { %v677_v47 = vmax.f32 %v672_v13, 0.0 }
 0x2bc   :  { %v689_v11 = vmul.f32 %v685_v24, %v677_v47  ;;  %v699_v14 = vmul.f32 %v695_v56, %v677_v47  ;;  %v1634_v56 = vadd.f32 %v371_v43, %v273_v50 }
 0x2be   :  { %453 = vrot.lane.b32.xlu0 %v1505_v62, %s1323_s24  ;;  %710 = vrot.lane.b32.xlu2 %v699_v14, %s1327_s10  ;;  %v693_v59 = vadd.f32 %v689_v11, %v683_v15  ;;  %v474_v62 = vpop.permute.xlu1 %473  ;;  %v382_v42 = vmax.f32 %v1634_v56, 0.0  ;;  %v1654_v11 = vadd.f32 %v378_v2, %v273_v50 }
 0x2bf   :  { %v485_v35 = vadd.f32 %v474_v62, %v459_v31 }
 0x2c0   :  { %v507_v47 = vmul.f32 %v506_v7, %v382_v42  ;;  %v388_v33 = vmax.f32 %v1654_v11, 0.0 }
 0x2c6   :  { %v480_v13 = vpop.permute.xlu1 %479 }
 0x302   :  { %v707_v25 = vpop.permute.xlu2 %706 }
 0x303   :  { %v717_v29 = vadd.f32 %v707_v25, %v691_v63 }
 0x305   :  { %v1614_v30 = vadd.f32 %v717_v29, %v486_v27  ;;  %v1678_v27 = vadd.f32 %v376_v49, %v273_v50  ;;  %v510_v29 = vmul.f32 %v506_v7, %v388_v33 }
 0x307   :  { %754 = vrot.lane.b32.xlu1 %v1614_v30, %s1326_s4  ;;  %v737_v39 = vrot.slane %v1614_v30, 1  ;;  %v725_v41 = vrot.slane %v1614_v30, 7  ;;  %v386_v31 = vmax.f32 %v1678_v27, 0.0 }
 0x309   :  { %v509_v10 = vmul.f32 %v506_v7, %v386_v31 }
 0x30a   :  { %v705_v32 = vpop.permute.xlu2 %704 }
 0x30b   :  { %v716_v37 = vadd.f32 %v705_v32, %v690_v51  ;;  %v461_v51 = vadd.f32 %v452_v17, %v435_v48  ;;  %v1657_v17 = vadd.f32 %v373_v45, %v273_v50  ;;  %v1109_v32 = vld [vmem:[#allocation10 + $0x20] sm:$0xff] }
 0x30c   :  { %851 = vmatpush.bf16.msra.mxu3 %v1109_v32 }
 0x30d   :  { %v1618_v36 = vadd.f32 %v716_v37, %v485_v35  ;;  %v487_v53 = vadd.f32 %v478_v21, %v461_v51  ;;  %v1108_v35 = vld [vmem:[#allocation10 + $0x18] sm:$0xff]  ;;  %v1107_v37 = vld [vmem:[#allocation10 + $0x10] sm:$0xff] }
 0x30f   :  { %752 = vrot.lane.b32.xlu0 %v1618_v36, %s1326_s4  ;;  %v736_v38 = vrot.slane %v1618_v36, 1  ;;  %v724_v40 = vrot.slane %v1618_v36, 7 }
 0x310   :  { %852 = vmatpush.bf16.msra.mxu3 %v1108_v35 }
 0x311   :  { %v742_v44 = vsel %vm197_vm0, %v736_v38, %v737_v39  ;;  %v1630_v24 = vsel %vm176_vm3, %v724_v40, %v725_v41 }
 0x314   :  { %853 = vmatpush.bf16.msra.mxu3 %v1107_v37 }
 0x318   :  { %v711_v9 = vpop.permute.xlu2 %710 }
 0x319   :  { %v719_v14 = vadd.f32 %v711_v9, %v693_v59  ;;  %v384_v59 = vmax.f32 %v1657_v17, 0.0 }
 0x31b   :  { %v508_v62 = vmul.f32 %v506_v7, %v384_v59 }
 0x328   :  { %v709_v52 = vpop.permute.xlu0 %708 }
 0x329   :  { %v718_v54 = vadd.f32 %v709_v52, %v692_v12 }
 0x32b   :  { %v1636_v57 = vadd.f32 %v718_v54, %v487_v53 }
 0x32d   :  { %756 = vrot.lane.b32.xlu0 %v1636_v57, %s1326_s4  ;;  %v738_v60 = vrot.slane %v1636_v57, 1  ;;  %v726_v63 = vrot.slane %v1636_v57, 7 }
 0x32f   :  { %v741_v4 = vsel %vm197_vm0, %v737_v39, %v738_v60  ;;  %v1648_v5 = vsel %vm176_vm3, %v725_v41, %v726_v63  ;;  %v1105_v39 = vld [vmem:[#allocation10] sm:$0xff] }
 0x330   :  { %v454_v28 = vpop.permute.xlu0 %453  ;;  %v745_v61 = vsel %vm1430_vm1, %v741_v4, 0.0  ;;  %v734_v6 = vsel %vm1467_vm8, %v1648_v5, 0.0 }
 0x331   :  { %v462_v12 = vadd.f32 %v454_v28, %v436_v58  ;;  %v1163_v55 = vpack.i.bf16 %v745_v61, %v742_v44 }
 0x333   :  { %v488_v15 = vadd.f32 %v480_v13, %v462_v12  ;;  %1164 = vrot.lane.b32.xlu2 %v1163_v55, %s1323_s24  ;;  %v878_v12 = vstv %s1085_s21  ;;  %v888_v55 = vstv %s1086_s0 }
 0x335   :  { %v1659_v18 = vadd.f32 %v719_v14, %v488_v15  ;;  %515 = vrot.lane.b32.xlu0 %v507_v47, %s1327_s10  ;;  %v872_v47 = vstv %s1084_s22 }
 0x337   :  { %758 = vrot.lane.b32.xlu1 %v1659_v18, %s1326_s4  ;;  %v739_v16 = vrot.slane %v1659_v18, 1  ;;  %v727_v19 = vrot.slane %v1659_v18, 7  ;;  %s953_s4 = sshll.u32 %s1752_s8, 4  ;;  %s954_s4 = int_to_ptr.hbm [resolvable:$true] %s953_s4 }
 0x339   :  { %v740_v20 = vsel %vm197_vm0, %v738_v60, %v739_v16  ;;  %v743_v21 = vsel %vm197_vm0, %v739_v16, %v736_v38  ;;  %v731_v22 = vsel %vm176_vm3, %v727_v19, %v724_v40  ;;  %v728_v23 = vsel %vm176_vm3, %v726_v63, %v727_v19  ;;  %v1106_v38 = vld [vmem:[#allocation10 + $0x8] sm:$0xff] }
 0x33a   :  { %v747_v25 = vsel %vm1434_vm2, %v743_v21, 0.0  ;;  %854 = vmatpush.bf16.msra.mxu3 %v1106_v38  ;;  %v732_v44 = vsel %vm1449_vm4, %v731_v22, 0.0  ;;  %v873_v16 = vmul.f32 %v872_v47, %v1618_v36  ;;  %v875_v36 = vmul.f32 %v872_v47, %v1636_v57 }
 0x33b   :  { %v1168_v46 = vpack.i.bf16 %v747_v25, %v740_v20 }
 0x33d   :  { %521 = vrot.lane.b32.xlu0 %v510_v29, %s1327_s10  ;;  %1169 = vrot.lane.b32.xlu2 %v1168_v46, %s1323_s24  ;;  %v874_v29 = vmul.f32 %v872_v47, %v1614_v30  ;;  %v876_v30 = vmul.f32 %v872_v47, %v1659_v18 }
 0x33e   :  { %855 = vmatpush.bf16.msra.mxu3 %v1105_v39 }
 0x33f   :  { %517 = vrot.lane.b32.xlu1 %v508_v62, %s1327_s10 }
 0x345   :  { %519 = vrot.lane.b32.xlu2 %v509_v10, %s1327_s10 }
 0x379   :  { %v755_v40 = vpop.permute.xlu1 %754 }
 0x37a   :  { %923 = vst.msk [vmem:[#allocation12 + $0x8] sm:$0xff] %vm921_vm9, %v755_v40  ;;  %v781_v49 = vsel %vm246_vm5, %v1630_v24, %v755_v40 }
 0x381   :  { %v753_v41 = vpop.permute.xlu0 %752 }
 0x382   :  { %922 = vst.msk [vmem:[#allocation12] sm:$0xff] %vm921_vm9, %v753_v41  ;;  %v780_v50 = vsel %vm246_vm5, %v732_v44, %v753_v41 }
 0x38d   :  { %v1165_v43 = vpop.permute.xlu2 %1164 }
 0x38e   :  { %v1167_v45 = vunpack.i.h.bf16 %v1165_v43  ;;  %v1166_v48 = vunpack.i.l.bf16 %v1165_v43 }
 0x390   :  { %v784_v51 = vsel %vm251_vm6, %v780_v50, %v1166_v48  ;;  %v785_v52 = vsel %vm251_vm6, %v781_v49, %v1167_v45  ;;  %v496_v48 = vstv %s1027_s7  ;;  %v490_v49 = vstv %s1026_s1 }
 0x391   :  { %v788_v53 = vpack.c.bf16 %v785_v52, %v784_v51  ;;  %v498_v57 = vmul.f32 %v496_v48, %v384_v59  ;;  %v492_v50 = vmul.f32 %v490_v49, %v1401_v1  ;;  %v497_v18 = vmul.f32 %v496_v48, %v382_v42 }
 0x393   :  { %1082 = vmatmul.msk.bf16.vlgmr.msra.gmra.mxu3 %vm336_vm7, %v788_v53  ;;  %v502_v52 = vadd.f32 %v498_v57, %v492_v50 }
 0x397   :  { %v1170_v58 = vpop.permute.xlu2 %1169 }
 0x398   :  { %v1172_v24 = vunpack.i.h.bf16 %v1170_v58  ;;  %v1171_v63 = vunpack.i.l.bf16 %v1170_v58 }
 0x39f   :  { %v757_v54 = vpop.permute.xlu0 %756  ;;  %v520_v45 = vpop.permute.xlu2 %519 }
 0x3a0   :  { %924 = vst.msk [vmem:[#allocation12 + $0x10] sm:$0xff] %vm921_vm9, %v757_v54  ;;  %v782_v60 = vsel %vm246_vm5, %v734_v6, %v757_v54 }
 0x3a1   :  { %v786_v7 = vsel %vm251_vm6, %v782_v60, %v1171_v63  ;;  %v491_v60 = vmul.f32 %v490_v49, %v1399_v0  ;;  %v500_v0 = vmul.f32 %v496_v48, %v388_v33 }
 0x3a3   :  { %v501_v63 = vadd.f32 %v497_v18, %v491_v60 }
 0x3a9   :  { %v759_v2 = vpop.permute.xlu1 %758 }
 0x3aa   :  { %v783_v4 = vsel %vm246_vm5, %v728_v23, %v759_v2  ;;  %925 = vst.msk [vmem:[#allocation12 + $0x18] sm:$0xff] %vm921_vm9, %v759_v2 }
 0x3ab   :  { %v787_v9 = vsel %vm251_vm6, %v783_v4, %v1172_v24  ;;  %v516_v24 = vpop.permute.xlu0 %515 }
 0x3ac   :  { %v789_v28 = vpack.c.bf16 %v787_v9, %v786_v7  ;;  %v527_v17 = vadd.f32 %v516_v24, %v501_v63  ;;  %v499_v7 = vmul.f32 %v496_v48, %v386_v31  ;;  %v493_v9 = vmul.f32 %v490_v49, %v1403_v3 }
 0x3ae   :  { %1083 = vmatmul.msk.bf16.gmra.mxu3 %vm336_vm7, %v789_v28  ;;  %v503_v28 = vadd.f32 %v499_v7, %v493_v9 }
 0x3b0   :  { %v529_v56 = vadd.f32 %v520_v45, %v503_v28 }
 0x3b1   :  { %v518_v51 = vpop.permute.xlu1 %517 }
 0x3b2   :  { %v528_v54 = vadd.f32 %v518_v51, %v502_v52 }
 0x3b3   :  { %v522_v1 = vpop.permute.xlu0 %521 }
 0x416   :  { %v857_v5 = vpop.f32.mrf.mxu3 }
 0x417   :  { %v858_v61 = vadd.f32 %v1174_v26, %v857_v5  ;;  %v494_v5 = vmul.f32 %v490_v49, %v1410_v8 }
 0x419   :  { %v867_v13 = vmax.f32 %v858_v61, 0.0 }
 0x41b   :  { %v879_v14 = vmul.f32 %v878_v12, %v867_v13  ;;  %v889_v15 = vmul.f32 %v888_v55, %v867_v13 }
 0x41d   :  { %897 = vrot.lane.b32.xlu1 %v889_v15, %s1327_s10  ;;  %v883_v19 = vadd.f32 %v879_v14, %v873_v16 }
 0x41e   :  { %v859_v20 = vpop.f32.mrf.mxu3 }
 0x41f   :  { %v860_v21 = vadd.f32 %v1174_v26, %v859_v20 }
 0x421   :  { %v868_v22 = vmax.f32 %v860_v21, 0.0 }
 0x423   :  { %v880_v23 = vmul.f32 %v878_v12, %v868_v22  ;;  %v890_v25 = vmul.f32 %v888_v55, %v868_v22 }
 0x425   :  { %899 = vrot.lane.b32.xlu2 %v890_v25, %s1327_s10  ;;  %v884_v46 = vadd.f32 %v880_v23, %v874_v29 }
 0x431   :  { %v862_v62 = vpop.f32.mrf.mxu3 }
 0x432   :  { %v863_v10 = vadd.f32 %v1174_v26, %v862_v62 }
 0x434   :  { %v869_v34 = vmax.f32 %v863_v10, 0.0 }
 0x436   :  { %v881_v32 = vmul.f32 %v878_v12, %v869_v34  ;;  %v891_v35 = vmul.f32 %v888_v55, %v869_v34 }
 0x438   :  { %901 = vrot.lane.b32.xlu0 %v891_v35, %s1327_s10  ;;  %v885_v37 = vadd.f32 %v881_v32, %v875_v36 }
 0x439   :  { %v864_v38 = vpop.f32.mrf.mxu3 }
 0x43a   :  { %v865_v39 = vadd.f32 %v1174_v26, %v864_v38 }
 0x43c   :  { %v870_v40 = vmax.f32 %v865_v39, 0.0 }
 0x43e   :  { %v882_v41 = vmul.f32 %v878_v12, %v870_v40  ;;  %v892_v43 = vmul.f32 %v888_v55, %v870_v40  ;;  %v504_v12 = vadd.f32 %v500_v0, %v494_v5 }
 0x440   :  { %903 = vrot.lane.b32.xlu1 %v892_v43, %s1327_s10  ;;  %v886_v44 = vadd.f32 %v882_v41, %v876_v30  ;;  %v530_v13 = vadd.f32 %v522_v1, %v504_v12 }
 0x47f   :  { %v900_v53 = vpop.permute.xlu2 %899 }
 0x480   :  { %v910_v58 = vadd.f32 %v900_v53, %v884_v46 }
 0x482   :  { %v914_v6 = vadd.f32 %v910_v58, %v528_v54 }
 0x484   :  { %932 = vrot.lane.b32.xlu0 %v914_v6, %s1323_s24 }
 0x48f   :  { %v898_v2 = vpop.permute.xlu1 %897 }
 0x490   :  { %v909_v59 = vadd.f32 %v898_v2, %v883_v19 }
 0x492   :  { %v913_v4 = vadd.f32 %v909_v59, %v527_v17 }
 0x494   :  { %930 = vrot.lane.b32.xlu2 %v913_v4, %s1323_s24 }
 0x4aa   :  { %v902_v26 = vpop.permute.xlu0 %901 }
 0x4ab   :  { %v911_v42 = vadd.f32 %v902_v26, %v885_v37 }
 0x4ad   :  { %v915_v61 = vadd.f32 %v911_v42, %v529_v56 }
 0x4af   :  { %934 = vrot.lane.b32.xlu1 %v915_v61, %s1323_s24 }
 0x4b2   :  { %v904_v55 = vpop.permute.xlu1 %903 }
 0x4b3   :  { %v912_v47 = vadd.f32 %v904_v55, %v886_v44 }
 0x4b5   :  { %v916_v27 = vadd.f32 %v912_v47, %v530_v13 }
 0x4b7   :  { %936 = vrot.lane.b32.xlu2 %v916_v27, %s1323_s24 }
 0x4ee   :  { %v931_v3 = vpop.permute.xlu2 %930 }
 0x4ef   :  { %943 = vst.msk [vmem:[#allocation12] sm:$0xff] %vm942_vm10, %v931_v3 }
 0x4f6   :  { %v933_v31 = vpop.permute.xlu0 %932 }
 0x4f7   :  { %944 = vst.msk [vmem:[#allocation12 + $0x8] sm:$0xff] %vm942_vm10, %v933_v31 }
 0x511   :  { %v937_v14 = vpop.permute.xlu2 %936 }
 0x512   :  { %946 = vst.msk [vmem:[#allocation12 + $0x18] sm:$0xff] %vm942_vm10, %v937_v14 }
 0x521   :  { %v935_v8 = vpop.permute.xlu1 %934 }
 0x522   :  { %945 = vst.msk [vmem:[#allocation12 + $0x10] sm:$0xff] %vm942_vm10, %v935_v8 }
 0x523   :  { %959 = dma.vmem_to_hbm [thread:$0]  %s952_s27, 512, %s954_s4, [#allocation4], %s1318_s13, %s1318_s13, %s1319_s14  }
 0x524   :  { %1315 = dma.done.wait [#allocation4], 512  }
 0x525   :  { %1316 = vsyncadd [#allocation4], 4294966784 }
 0x526   :  { %964 = vsyncpa [#allocation3], 1 }
 0x527   :  { %965 = vsyncpa [#allocation8], 1 }
 0x528   :  { %966 = vsyncpa [#allocation11], 1 }
 0x529   :  { %967 = vsyncpa [#allocation4], 1 }
 0x52a   :  { %968 = vsyncpa [#allocation5], 1 }

</bundles_post_ra>
